<compile_context>
chip_gen: v7x
topology: tpu7x:2x2x1
jax: 0.10.0
libtpu: 0.0.40
codegen_flags: <defaults>
</compile_context>

<pallas_src>
import math
import jax
import jax.numpy as jnp
from jax import lax
from jax.experimental import pallas as pl
from jax.experimental.pallas import tpu as pltpu


# --------------------------------------------------------------------------
# Fused FPT-content kernel: one grid step = one batch element.
#   x4: (C, N4) queries, x2: (C, N2), x1: (C, N1) key/value sources
#   w_*: (3, C, C)  = stacked [Wq (scale folded), Wk, Wv], (Cout, Cin) layout
#   wf : (4, C, C)  = fuse 1x1 conv split per concat branch, (Cout, Cin)
#   b  : (C, 1)     = fuse bias
#   out: (C, N4)
# --------------------------------------------------------------------------
def _fpt_content_kernel(x4_ref, x2_ref, x1_ref,
                        w_self_ref, w_g2_ref, w_g1_ref,
                        wf_ref, b_ref, o_ref):
    f32 = jnp.float32
    b16 = jnp.bfloat16

    # Activations cast to bf16 once (MXU operands); everything stays in VMEM/vregs.
    x4 = x4_ref[0].astype(b16)   # (C, N4)
    x2 = x2_ref[0].astype(b16)   # (C, N2)
    x1 = x1_ref[0].astype(b16)   # (C, N1)

    def attn(xq, xkv, w3_ref):
        wq = w3_ref[0]           # (C, C) bf16, 1/sqrt(C) already folded in
        wk = w3_ref[1]
        wv = w3_ref[2]
        # Projections in the channels-first ("transposed") convention: no
        # wrapper-side transposes needed.
        qT = jnp.dot(wq, xq, preferred_element_type=f32)    # (C, Nq)
        kT = jnp.dot(wk, xkv, preferred_element_type=f32)   # (C, Nk)
        # scores: contract the channel axis (dim 0 of both) -- no explicit k.T
        s = lax.dot_general(qT.astype(b16), kT.astype(b16),
                            (((0,), (0,)), ((), ())),
                            preferred_element_type=f32)     # (Nq, Nk)
        # softmax over keys, all in f32 (v5e-safe); divide -> EUP reciprocal
        m = jnp.max(s, axis=-1, keepdims=True)
        e = jnp.exp(s - m)
        p = e * pl.reciprocal(jnp.sum(e, axis=-1, keepdims=True), approx=True)
        vT = jnp.dot(wv, xkv, preferred_element_type=f32)   # (C, Nk)
        # out^T = v^T @ p^T : contract Nk (last dims of both) -- no explicit p.T
        oT = lax.dot_general(vT.astype(b16), p.astype(b16),
                             (((1,), (1,)), ((), ())),
                             preferred_element_type=f32)    # (C, Nq)
        return oT.astype(b16)

    self_oT = attn(x4, x4, w_self_ref)   # self-transform on res4
    g2_oT = attn(x4, x2, w_g2_ref)       # grounding: res4 queries, res2 kv
    g1_oT = attn(x4, x1, w_g1_ref)       # grounding: res4 queries, res1 kv

    # concat([t4, self, grd2, grd1]) @ fuse_w  ==  sum of 4 per-branch matmuls,
    # accumulated in f32 (avoids materializing the (Nq, 4C) concat).
    acc = jnp.dot(wf_ref[0], x4, preferred_element_type=f32)        # (C, Nq)
    acc = acc + jnp.dot(wf_ref[1], self_oT, preferred_element_type=f32)
    acc = acc + jnp.dot(wf_ref[2], g2_oT, preferred_element_type=f32)
    acc = acc + jnp.dot(wf_ref[3], g1_oT, preferred_element_type=f32)
    o_ref[0] = (acc + b_ref[...]).astype(o_ref.dtype)


def fpt_content_forward(params, res1, res2, res4):
    B, C, H4, W4 = res4.shape
    N4 = H4 * W4
    N2 = res2.shape[2] * res2.shape[3]
    N1 = res1.shape[2] * res1.shape[3]

    # NCHW -> (B, C, H*W) is a metadata-only reshape (no transpose launched).
    x4 = res4.reshape(B, C, N4)
    x2 = res2.reshape(B, C, N2)
    x1 = res1.reshape(B, C, N1)

    out = pl.pallas_call(
        _fpt_content_kernel,
        out_shape=jax.ShapeDtypeStruct((B, C, N4), jnp.float32),
        grid=(B,),
        in_specs=[
            pl.BlockSpec((1, C, N4), lambda b: (b, 0, 0)),
            pl.BlockSpec((1, C, N2), lambda b: (b, 0, 0)),
            pl.BlockSpec((1, C, N1), lambda b: (b, 0, 0)),
            # Weights: full-array blocks, constant index_map (fetched once).
            pl.BlockSpec((3, C, C), lambda b: (0, 0, 0)),
            pl.BlockSpec((3, C, C), lambda b: (0, 0, 0)),
            pl.BlockSpec((3, C, C), lambda b: (0, 0, 0)),
            pl.BlockSpec((4, C, C), lambda b: (0, 0, 0)),
            pl.BlockSpec((C, 1), lambda b: (0, 0)),
        ],
        out_specs=pl.BlockSpec((1, C, N4), lambda b: (b, 0, 0)),
        compiler_params=pltpu.CompilerParams(
            dimension_semantics=("parallel",)),   # v7x: batch across both TCs
    )(x4, x2, x1,
      params["w_self"], params["w_g2"], params["w_g1"],
      params["fuse_w"], params["fuse_b"])

    return out.reshape(B, C, H4, W4)


# --------------------------------------------------------------------------
# Parameter setup (random init; pretrained PSGAN weights would slot in with
# the same (Cout, Cin) layout).
# --------------------------------------------------------------------------
def init_fpt_content_params(in_dim, key):
    ks = jax.random.split(key, 4)
    std = 0.05
    attn_scale = 1.0 / math.sqrt(in_dim)

    def qkv(k):
        w = jax.random.normal(k, (3, in_dim, in_dim), jnp.float32) * std
        # Fold the 1/sqrt(C) attention scale into the query projection (f32),
        # then store as bf16 for the MXU.
        w = w.at[0].multiply(attn_scale)
        return w.astype(jnp.bfloat16)

    return {
        "w_self": qkv(ks[0]),
        "w_g2": qkv(ks[1]),
        "w_g1": qkv(ks[2]),
        "fuse_w": (jax.random.normal(ks[3], (4, in_dim, in_dim), jnp.float32)
                   * std).astype(jnp.bfloat16),
        "fuse_b": jnp.zeros((in_dim, 1), jnp.float32),
    }


class ContentSA:
    """JAX/Pallas port of Content_SA(in_dim) -> wraps FPT_content(feature_dim=in_dim)."""

    def __init__(self, in_dim, key):
        self.params = init_fpt_content_params(in_dim, key)

    def __call__(self, style_feat):
        # exact Content_SA.forward semantics: pick indices 1..4; res3 unused.
        res1, res2, res3, res4 = (style_feat[1], style_feat[2],
                                  style_feat[3], style_feat[4])
        del res3
        return fpt_content_forward(self.params, res1, res2, res4)


if __name__ == "__main__":
    B, C = 2, 32
    key = jax.random.PRNGKey(0)
    k0, k1, k2, k3, k4, kp = jax.random.split(key, 6)

    # style_feat mimics a feature pyramid: indices 0..4, halving resolution.
    style_feat = [
        jax.random.normal(k0, (B, C, 32, 32), jnp.float32),   # [0] (unused)
        jax.random.normal(k1, (B, C, 16, 16), jnp.float32),   # [1] res1
        jax.random.normal(k2, (B, C, 8, 8), jnp.float32),     # [2] res2
        jax.random.normal(k3, (B, C, 8, 8), jnp.float32),     # [3] res3 (unused)
        jax.random.normal(k4, (B, C, 4, 4), jnp.float32),     # [4] res4
    ]

    model = ContentSA(in_dim=C, key=kp)
    out = model(style_feat)
    out = jax.block_until_ready(out)
    assert out.shape == (B, C, 4, 4), out.shape
    assert jnp.all(jnp.isfinite(out))
    print("KERNEL_OK")
</pallas_src>

<mosaic_0001>
module attributes {stable_mosaic.version = 11 : i64} {
  func.func @_fpt_content_kernel(%arg0: i32, %arg1: memref<1x32x16xf32, #tpu.memory_space<vmem>>, %arg2: memref<1x32x64xf32, #tpu.memory_space<vmem>>, %arg3: memref<1x32x256xf32, #tpu.memory_space<vmem>>, %arg4: memref<3x32x32xbf16, #tpu.memory_space<vmem>>, %arg5: memref<3x32x32xbf16, #tpu.memory_space<vmem>>, %arg6: memref<3x32x32xbf16, #tpu.memory_space<vmem>>, %arg7: memref<4x32x32xbf16, #tpu.memory_space<vmem>>, %arg8: memref<32x1xf32, #tpu.memory_space<vmem>>, %arg9: memref<1x32x16xf32, #tpu.memory_space<vmem>>) attributes {dimension_semantics = [#tpu.dimension_semantics<parallel>], iteration_bounds = array<i64: 2>, scalar_prefetch = 0 : i64, scratch_operands = 0 : i64, tpu.core_type = #tpu.core_type<tc>, window_params = [{transform_indices = @transform_0, window_bounds = array<i64: 1, 32, 16>}, {transform_indices = @transform_1, window_bounds = array<i64: 1, 32, 64>}, {transform_indices = @transform_2, window_bounds = array<i64: 1, 32, 256>}, {pipeline_mode = #tpu.pipeline_mode<synchronous>, transform_indices = @transform_3, window_bounds = array<i64: 3, 32, 32>}, {pipeline_mode = #tpu.pipeline_mode<synchronous>, transform_indices = @transform_4, window_bounds = array<i64: 3, 32, 32>}, {pipeline_mode = #tpu.pipeline_mode<synchronous>, transform_indices = @transform_5, window_bounds = array<i64: 3, 32, 32>}, {pipeline_mode = #tpu.pipeline_mode<synchronous>, transform_indices = @transform_6, window_bounds = array<i64: 4, 32, 32>}, {pipeline_mode = #tpu.pipeline_mode<synchronous>, transform_indices = @transform_7, window_bounds = array<i64: 32, 1>}, {transform_indices = @transform_8, window_bounds = array<i64: 1, 32, 16>}]} {
    %c0 = arith.constant 0 : index
    %c0_0 = arith.constant 0 : index
    %c0_1 = arith.constant 0 : index
    %0 = vector.load %arg1[%c0, %c0_0, %c0_1] : memref<1x32x16xf32, #tpu.memory_space<vmem>>, vector<1x32x16xf32>
    %1 = vector.shape_cast %0 : vector<1x32x16xf32> to vector<32x16xf32>
    %2 = arith.truncf %1 : vector<32x16xf32> to vector<32x16xbf16>
    %c0_2 = arith.constant 0 : index
    %c0_3 = arith.constant 0 : index
    %c0_4 = arith.constant 0 : index
    %3 = vector.load %arg2[%c0_2, %c0_3, %c0_4] : memref<1x32x64xf32, #tpu.memory_space<vmem>>, vector<1x32x64xf32>
    %4 = vector.shape_cast %3 : vector<1x32x64xf32> to vector<32x64xf32>
    %5 = arith.truncf %4 : vector<32x64xf32> to vector<32x64xbf16>
    %c0_5 = arith.constant 0 : index
    %c0_6 = arith.constant 0 : index
    %c0_7 = arith.constant 0 : index
    %6 = vector.load %arg3[%c0_5, %c0_6, %c0_7] : memref<1x32x256xf32, #tpu.memory_space<vmem>>, vector<1x32x256xf32>
    %7 = vector.shape_cast %6 : vector<1x32x256xf32> to vector<32x256xf32>
    %8 = arith.truncf %7 : vector<32x256xf32> to vector<32x256xbf16>
    %c0_8 = arith.constant 0 : index
    %c0_9 = arith.constant 0 : index
    %c0_10 = arith.constant 0 : index
    %9 = vector.load %arg4[%c0_8, %c0_9, %c0_10] : memref<3x32x32xbf16, #tpu.memory_space<vmem>>, vector<1x32x32xbf16>
    %10 = vector.shape_cast %9 : vector<1x32x32xbf16> to vector<32x32xbf16>
    %c1 = arith.constant 1 : index
    %c0_11 = arith.constant 0 : index
    %c0_12 = arith.constant 0 : index
    %11 = vector.load %arg4[%c1, %c0_11, %c0_12] : memref<3x32x32xbf16, #tpu.memory_space<vmem>>, vector<1x32x32xbf16>
    %12 = vector.shape_cast %11 : vector<1x32x32xbf16> to vector<32x32xbf16>
    %c2 = arith.constant 2 : index
    %c0_13 = arith.constant 0 : index
    %c0_14 = arith.constant 0 : index
    %13 = vector.load %arg4[%c2, %c0_13, %c0_14] : memref<3x32x32xbf16, #tpu.memory_space<vmem>>, vector<1x32x32xbf16>
    %14 = vector.shape_cast %13 : vector<1x32x32xbf16> to vector<32x32xbf16>
    %cst = arith.constant dense<0.000000e+00> : vector<32x16xf32>
    %15 = tpu.matmul %10, %2, %cst {dimension_numbers = #tpu.dot_dimension_numbers<[1], [0], [0], [1], [0, 0, 1, 1], [], []>} : vector<32x32xbf16>, vector<32x16xbf16>, vector<32x16xf32> -> vector<32x16xf32>
    %cst_15 = arith.constant dense<0.000000e+00> : vector<32x16xf32>
    %16 = tpu.matmul %12, %2, %cst_15 {dimension_numbers = #tpu.dot_dimension_numbers<[1], [0], [0], [1], [0, 0, 1, 1], [], []>} : vector<32x32xbf16>, vector<32x16xbf16>, vector<32x16xf32> -> vector<32x16xf32>
    %17 = arith.truncf %15 : vector<32x16xf32> to vector<32x16xbf16>
    %18 = arith.truncf %16 : vector<32x16xf32> to vector<32x16xbf16>
    %cst_16 = arith.constant dense<0.000000e+00> : vector<16x16xf32>
    %19 = tpu.matmul %17, %18, %cst_16 {dimension_numbers = #tpu.dot_dimension_numbers<[0], [0], [1], [1], [0, 1, 1, 1], [], []>} : vector<32x16xbf16>, vector<32x16xbf16>, vector<16x16xf32> -> vector<16x16xf32>
    %cst_17 = arith.constant dense<0xFF800000> : vector<16xf32>
    %20 = vector.multi_reduction <maximumf>, %19, %cst_17 [1] : vector<16x16xf32> to vector<16xf32>
    %21 = vector.shape_cast %20 : vector<16xf32> to vector<16x1xf32>
    %22 = vector.broadcast %21 : vector<16x1xf32> to vector<16x16xf32>
    %23 = arith.subf %19, %22 : vector<16x16xf32>
    %24 = math.exp %23 : vector<16x16xf32>
    %cst_18 = arith.constant dense<0.000000e+00> : vector<16xf32>
    %25 = vector.multi_reduction <add>, %24, %cst_18 [1] : vector<16x16xf32> to vector<16xf32>
    %26 = vector.shape_cast %25 : vector<16xf32> to vector<16x1xf32>
    %27 = tpu.reciprocal %26 {approx = true} : vector<16x1xf32> -> vector<16x1xf32>
    %28 = vector.broadcast %27 : vector<16x1xf32> to vector<16x16xf32>
    %29 = arith.mulf %24, %28 : vector<16x16xf32>
    %cst_19 = arith.constant dense<0.000000e+00> : vector<32x16xf32>
    %30 = tpu.matmul %14, %2, %cst_19 {dimension_numbers = #tpu.dot_dimension_numbers<[1], [0], [0], [1], [0, 0, 1, 1], [], []>} : vector<32x32xbf16>, vector<32x16xbf16>, vector<32x16xf32> -> vector<32x16xf32>
    %31 = arith.truncf %30 : vector<32x16xf32> to vector<32x16xbf16>
    %32 = arith.truncf %29 : vector<16x16xf32> to vector<16x16xbf16>
    %cst_20 = arith.constant dense<0.000000e+00> : vector<32x16xf32>
    %33 = tpu.matmul %31, %32, %cst_20 {dimension_numbers = #tpu.dot_dimension_numbers<[1], [1], [0], [0], [0, 0, 1, 0], [], []>} : vector<32x16xbf16>, vector<16x16xbf16>, vector<32x16xf32> -> vector<32x16xf32>
    %34 = arith.truncf %33 : vector<32x16xf32> to vector<32x16xbf16>
    %c0_21 = arith.constant 0 : index
    %c0_22 = arith.constant 0 : index
    %c0_23 = arith.constant 0 : index
    %35 = vector.load %arg5[%c0_21, %c0_22, %c0_23] : memref<3x32x32xbf16, #tpu.memory_space<vmem>>, vector<1x32x32xbf16>
    %36 = vector.shape_cast %35 : vector<1x32x32xbf16> to vector<32x32xbf16>
    %c1_24 = arith.constant 1 : index
    %c0_25 = arith.constant 0 : index
    %c0_26 = arith.constant 0 : index
    %37 = vector.load %arg5[%c1_24, %c0_25, %c0_26] : memref<3x32x32xbf16, #tpu.memory_space<vmem>>, vector<1x32x32xbf16>
    %38 = vector.shape_cast %37 : vector<1x32x32xbf16> to vector<32x32xbf16>
    %c2_27 = arith.constant 2 : index
    %c0_28 = arith.constant 0 : index
    %c0_29 = arith.constant 0 : index
    %39 = vector.load %arg5[%c2_27, %c0_28, %c0_29] : memref<3x32x32xbf16, #tpu.memory_space<vmem>>, vector<1x32x32xbf16>
    %40 = vector.shape_cast %39 : vector<1x32x32xbf16> to vector<32x32xbf16>
    %cst_30 = arith.constant dense<0.000000e+00> : vector<32x16xf32>
    %41 = tpu.matmul %36, %2, %cst_30 {dimension_numbers = #tpu.dot_dimension_numbers<[1], [0], [0], [1], [0, 0, 1, 1], [], []>} : vector<32x32xbf16>, vector<32x16xbf16>, vector<32x16xf32> -> vector<32x16xf32>
    %cst_31 = arith.constant dense<0.000000e+00> : vector<32x64xf32>
    %42 = tpu.matmul %38, %5, %cst_31 {dimension_numbers = #tpu.dot_dimension_numbers<[1], [0], [0], [1], [0, 0, 1, 1], [], []>} : vector<32x32xbf16>, vector<32x64xbf16>, vector<32x64xf32> -> vector<32x64xf32>
    %43 = arith.truncf %41 : vector<32x16xf32> to vector<32x16xbf16>
    %44 = arith.truncf %42 : vector<32x64xf32> to vector<32x64xbf16>
    %cst_32 = arith.constant dense<0.000000e+00> : vector<16x64xf32>
    %45 = tpu.matmul %43, %44, %cst_32 {dimension_numbers = #tpu.dot_dimension_numbers<[0], [0], [1], [1], [0, 1, 1, 1], [], []>} : vector<32x16xbf16>, vector<32x64xbf16>, vector<16x64xf32> -> vector<16x64xf32>
    %cst_33 = arith.constant dense<0xFF800000> : vector<16xf32>
    %46 = vector.multi_reduction <maximumf>, %45, %cst_33 [1] : vector<16x64xf32> to vector<16xf32>
    %47 = vector.shape_cast %46 : vector<16xf32> to vector<16x1xf32>
    %48 = vector.broadcast %47 : vector<16x1xf32> to vector<16x64xf32>
    %49 = arith.subf %45, %48 : vector<16x64xf32>
    %50 = math.exp %49 : vector<16x64xf32>
    %cst_34 = arith.constant dense<0.000000e+00> : vector<16xf32>
    %51 = vector.multi_reduction <add>, %50, %cst_34 [1] : vector<16x64xf32> to vector<16xf32>
    %52 = vector.shape_cast %51 : vector<16xf32> to vector<16x1xf32>
    %53 = tpu.reciprocal %52 {approx = true} : vector<16x1xf32> -> vector<16x1xf32>
    %54 = vector.broadcast %53 : vector<16x1xf32> to vector<16x64xf32>
    %55 = arith.mulf %50, %54 : vector<16x64xf32>
    %cst_35 = arith.constant dense<0.000000e+00> : vector<32x64xf32>
    %56 = tpu.matmul %40, %5, %cst_35 {dimension_numbers = #tpu.dot_dimension_numbers<[1], [0], [0], [1], [0, 0, 1, 1], [], []>} : vector<32x32xbf16>, vector<32x64xbf16>, vector<32x64xf32> -> vector<32x64xf32>
    %57 = arith.truncf %56 : vector<32x64xf32> to vector<32x64xbf16>
    %58 = arith.truncf %55 : vector<16x64xf32> to vector<16x64xbf16>
    %cst_36 = arith.constant dense<0.000000e+00> : vector<32x16xf32>
    %59 = tpu.matmul %57, %58, %cst_36 {dimension_numbers = #tpu.dot_dimension_numbers<[1], [1], [0], [0], [0, 0, 1, 0], [], []>} : vector<32x64xbf16>, vector<16x64xbf16>, vector<32x16xf32> -> vector<32x16xf32>
    %60 = arith.truncf %59 : vector<32x16xf32> to vector<32x16xbf16>
    %c0_37 = arith.constant 0 : index
    %c0_38 = arith.constant 0 : index
    %c0_39 = arith.constant 0 : index
    %61 = vector.load %arg6[%c0_37, %c0_38, %c0_39] : memref<3x32x32xbf16, #tpu.memory_space<vmem>>, vector<1x32x32xbf16>
    %62 = vector.shape_cast %61 : vector<1x32x32xbf16> to vector<32x32xbf16>
    %c1_40 = arith.constant 1 : index
    %c0_41 = arith.constant 0 : index
    %c0_42 = arith.constant 0 : index
    %63 = vector.load %arg6[%c1_40, %c0_41, %c0_42] : memref<3x32x32xbf16, #tpu.memory_space<vmem>>, vector<1x32x32xbf16>
    %64 = vector.shape_cast %63 : vector<1x32x32xbf16> to vector<32x32xbf16>
    %c2_43 = arith.constant 2 : index
    %c0_44 = arith.constant 0 : index
    %c0_45 = arith.constant 0 : index
    %65 = vector.load %arg6[%c2_43, %c0_44, %c0_45] : memref<3x32x32xbf16, #tpu.memory_space<vmem>>, vector<1x32x32xbf16>
    %66 = vector.shape_cast %65 : vector<1x32x32xbf16> to vector<32x32xbf16>
    %cst_46 = arith.constant dense<0.000000e+00> : vector<32x16xf32>
    %67 = tpu.matmul %62, %2, %cst_46 {dimension_numbers = #tpu.dot_dimension_numbers<[1], [0], [0], [1], [0, 0, 1, 1], [], []>} : vector<32x32xbf16>, vector<32x16xbf16>, vector<32x16xf32> -> vector<32x16xf32>
    %cst_47 = arith.constant dense<0.000000e+00> : vector<32x256xf32>
    %68 = tpu.matmul %64, %8, %cst_47 {dimension_numbers = #tpu.dot_dimension_numbers<[1], [0], [0], [1], [0, 0, 1, 1], [], []>} : vector<32x32xbf16>, vector<32x256xbf16>, vector<32x256xf32> -> vector<32x256xf32>
    %69 = arith.truncf %67 : vector<32x16xf32> to vector<32x16xbf16>
    %70 = arith.truncf %68 : vector<32x256xf32> to vector<32x256xbf16>
    %cst_48 = arith.constant dense<0.000000e+00> : vector<16x256xf32>
    %71 = tpu.matmul %69, %70, %cst_48 {dimension_numbers = #tpu.dot_dimension_numbers<[0], [0], [1], [1], [0, 1, 1, 1], [], []>} : vector<32x16xbf16>, vector<32x256xbf16>, vector<16x256xf32> -> vector<16x256xf32>
    %cst_49 = arith.constant dense<0xFF800000> : vector<16xf32>
    %72 = vector.multi_reduction <maximumf>, %71, %cst_49 [1] : vector<16x256xf32> to vector<16xf32>
    %73 = vector.shape_cast %72 : vector<16xf32> to vector<16x1xf32>
    %74 = vector.broadcast %73 : vector<16x1xf32> to vector<16x256xf32>
    %75 = arith.subf %71, %74 : vector<16x256xf32>
    %76 = math.exp %75 : vector<16x256xf32>
    %cst_50 = arith.constant dense<0.000000e+00> : vector<16xf32>
    %77 = vector.multi_reduction <add>, %76, %cst_50 [1] : vector<16x256xf32> to vector<16xf32>
    %78 = vector.shape_cast %77 : vector<16xf32> to vector<16x1xf32>
    %79 = tpu.reciprocal %78 {approx = true} : vector<16x1xf32> -> vector<16x1xf32>
    %80 = vector.broadcast %79 : vector<16x1xf32> to vector<16x256xf32>
    %81 = arith.mulf %76, %80 : vector<16x256xf32>
    %cst_51 = arith.constant dense<0.000000e+00> : vector<32x256xf32>
    %82 = tpu.matmul %66, %8, %cst_51 {dimension_numbers = #tpu.dot_dimension_numbers<[1], [0], [0], [1], [0, 0, 1, 1], [], []>} : vector<32x32xbf16>, vector<32x256xbf16>, vector<32x256xf32> -> vector<32x256xf32>
    %83 = arith.truncf %82 : vector<32x256xf32> to vector<32x256xbf16>
    %84 = arith.truncf %81 : vector<16x256xf32> to vector<16x256xbf16>
    %cst_52 = arith.constant dense<0.000000e+00> : vector<32x16xf32>
    %85 = tpu.matmul %83, %84, %cst_52 {dimension_numbers = #tpu.dot_dimension_numbers<[1], [1], [0], [0], [0, 0, 1, 0], [], []>} : vector<32x256xbf16>, vector<16x256xbf16>, vector<32x16xf32> -> vector<32x16xf32>
    %86 = arith.truncf %85 : vector<32x16xf32> to vector<32x16xbf16>
    %c0_53 = arith.constant 0 : index
    %c0_54 = arith.constant 0 : index
    %c0_55 = arith.constant 0 : index
    %87 = vector.load %arg7[%c0_53, %c0_54, %c0_55] : memref<4x32x32xbf16, #tpu.memory_space<vmem>>, vector<1x32x32xbf16>
    %88 = vector.shape_cast %87 : vector<1x32x32xbf16> to vector<32x32xbf16>
    %cst_56 = arith.constant dense<0.000000e+00> : vector<32x16xf32>
    %89 = tpu.matmul %88, %2, %cst_56 {dimension_numbers = #tpu.dot_dimension_numbers<[1], [0], [0], [1], [0, 0, 1, 1], [], []>} : vector<32x32xbf16>, vector<32x16xbf16>, vector<32x16xf32> -> vector<32x16xf32>
    %c1_57 = arith.constant 1 : index
    %c0_58 = arith.constant 0 : index
    %c0_59 = arith.constant 0 : index
    %90 = vector.load %arg7[%c1_57, %c0_58, %c0_59] : memref<4x32x32xbf16, #tpu.memory_space<vmem>>, vector<1x32x32xbf16>
    %91 = vector.shape_cast %90 : vector<1x32x32xbf16> to vector<32x32xbf16>
    %cst_60 = arith.constant dense<0.000000e+00> : vector<32x16xf32>
    %92 = tpu.matmul %91, %34, %cst_60 {dimension_numbers = #tpu.dot_dimension_numbers<[1], [0], [0], [1], [0, 0, 1, 1], [], []>} : vector<32x32xbf16>, vector<32x16xbf16>, vector<32x16xf32> -> vector<32x16xf32>
    %93 = arith.addf %89, %92 : vector<32x16xf32>
    %c2_61 = arith.constant 2 : index
    %c0_62 = arith.constant 0 : index
    %c0_63 = arith.constant 0 : index
    %94 = vector.load %arg7[%c2_61, %c0_62, %c0_63] : memref<4x32x32xbf16, #tpu.memory_space<vmem>>, vector<1x32x32xbf16>
    %95 = vector.shape_cast %94 : vector<1x32x32xbf16> to vector<32x32xbf16>
    %cst_64 = arith.constant dense<0.000000e+00> : vector<32x16xf32>
    %96 = tpu.matmul %95, %60, %cst_64 {dimension_numbers = #tpu.dot_dimension_numbers<[1], [0], [0], [1], [0, 0, 1, 1], [], []>} : vector<32x32xbf16>, vector<32x16xbf16>, vector<32x16xf32> -> vector<32x16xf32>
    %97 = arith.addf %93, %96 : vector<32x16xf32>
    %c3 = arith.constant 3 : index
    %c0_65 = arith.constant 0 : index
    %c0_66 = arith.constant 0 : index
    %98 = vector.load %arg7[%c3, %c0_65, %c0_66] : memref<4x32x32xbf16, #tpu.memory_space<vmem>>, vector<1x32x32xbf16>
    %99 = vector.shape_cast %98 : vector<1x32x32xbf16> to vector<32x32xbf16>
    %cst_67 = arith.constant dense<0.000000e+00> : vector<32x16xf32>
    %100 = tpu.matmul %99, %86, %cst_67 {dimension_numbers = #tpu.dot_dimension_numbers<[1], [0], [0], [1], [0, 0, 1, 1], [], []>} : vector<32x32xbf16>, vector<32x16xbf16>, vector<32x16xf32> -> vector<32x16xf32>
    %101 = arith.addf %97, %100 : vector<32x16xf32>
    %c0_68 = arith.constant 0 : index
    %c0_69 = arith.constant 0 : index
    %102 = vector.load %arg8[%c0_68, %c0_69] : memref<32x1xf32, #tpu.memory_space<vmem>>, vector<32x1xf32>
    %103 = vector.broadcast %102 : vector<32x1xf32> to vector<32x16xf32>
    %104 = arith.addf %101, %103 : vector<32x16xf32>
    %c0_70 = arith.constant 0 : index
    %c0_71 = arith.constant 0 : index
    %c0_72 = arith.constant 0 : index
    %105 = vector.load %arg9[%c0_70, %c0_71, %c0_72] : memref<1x32x16xf32, #tpu.memory_space<vmem>>, vector<1x32x16xf32>
    %106 = vector.shape_cast %105 : vector<1x32x16xf32> to vector<32x16xf32>
    %107 = vector.shape_cast %104 : vector<32x16xf32> to vector<1x32x16xf32>
    tpu.vector_store %arg9[%c0_70, %c0_71, %c0_72], %107 {strides = array<i32>} : memref<1x32x16xf32, #tpu.memory_space<vmem>>, vector<1x32x16xf32>,
    return
  }
  func.func @transform_0(%arg0: i32) -> (i32, i32, i32) {
    %c0_i32 = arith.constant 0 : i32
    %c0_i32_0 = arith.constant 0 : i32
    %c0_i32_1 = arith.constant 0 : i32
    return %arg0, %c0_i32, %c0_i32_0 : i32, i32, i32
  }
  func.func @transform_1(%arg0: i32) -> (i32, i32, i32) {
    %c0_i32 = arith.constant 0 : i32
    %c0_i32_0 = arith.constant 0 : i32
    %c0_i32_1 = arith.constant 0 : i32
    return %arg0, %c0_i32, %c0_i32_0 : i32, i32, i32
  }
  func.func @transform_2(%arg0: i32) -> (i32, i32, i32) {
    %c0_i32 = arith.constant 0 : i32
    %c0_i32_0 = arith.constant 0 : i32
    %c0_i32_1 = arith.constant 0 : i32
    return %arg0, %c0_i32, %c0_i32_0 : i32, i32, i32
  }
  func.func @transform_3(%arg0: i32) -> (i32, i32, i32) {
    %c0_i32 = arith.constant 0 : i32
    %c0_i32_0 = arith.constant 0 : i32
    %c0_i32_1 = arith.constant 0 : i32
    %c0_i32_2 = arith.constant 0 : i32
    return %c0_i32, %c0_i32_0, %c0_i32_1 : i32, i32, i32
  }
  func.func @transform_4(%arg0: i32) -> (i32, i32, i32) {
    %c0_i32 = arith.constant 0 : i32
    %c0_i32_0 = arith.constant 0 : i32
    %c0_i32_1 = arith.constant 0 : i32
    %c0_i32_2 = arith.constant 0 : i32
    return %c0_i32, %c0_i32_0, %c0_i32_1 : i32, i32, i32
  }
  func.func @transform_5(%arg0: i32) -> (i32, i32, i32) {
    %c0_i32 = arith.constant 0 : i32
    %c0_i32_0 = arith.constant 0 : i32
    %c0_i32_1 = arith.constant 0 : i32
    %c0_i32_2 = arith.constant 0 : i32
    return %c0_i32, %c0_i32_0, %c0_i32_1 : i32, i32, i32
  }
  func.func @transform_6(%arg0: i32) -> (i32, i32, i32) {
    %c0_i32 = arith.constant 0 : i32
    %c0_i32_0 = arith.constant 0 : i32
    %c0_i32_1 = arith.constant 0 : i32
    %c0_i32_2 = arith.constant 0 : i32
    return %c0_i32, %c0_i32_0, %c0_i32_1 : i32, i32, i32
  }
  func.func @transform_7(%arg0: i32) -> (i32, i32) {
    %c0_i32 = arith.constant 0 : i32
    %c0_i32_0 = arith.constant 0 : i32
    %c0_i32_1 = arith.constant 0 : i32
    return %c0_i32, %c0_i32_0 : i32, i32
  }
  func.func @transform_8(%arg0: i32) -> (i32, i32, i32) {
    %c0_i32 = arith.constant 0 : i32
    %c0_i32_0 = arith.constant 0 : i32
    %c0_i32_1 = arith.constant 0 : i32
    return %arg0, %c0_i32, %c0_i32_0 : i32, i32, i32
  }
}

</mosaic_0001>

<bundles_post_ra>
// kernel: tpu_custom_call.1
= control target key start
LH: loop header
LB: loop body
LE: loop exit
PB: predicated region body
PF: predicated region fallthrough
CT: control target
= control target key end

     0   :  { %13 = vsyncpa [#allocation3], 0  ;;  %s3016_s0 = inlined_call_operand.vmem [shape: f32[2,32,16], index: 0, kind: input, shape index: {}]   ;;  %s3017_s1 = inlined_call_operand.hbm [shape: f32[2,32,64], index: 1, kind: input, shape index: {}]   ;;  %s3018_s2 = inlined_call_operand.vmem [shape: f32[2,32,256], index: 2, kind: input, shape index: {}]   ;;  %s3019_s3 = inlined_call_operand.hbm [shape: bf16[3,32,32], index: 3, kind: input, shape index: {}]   ;;  %s3020_s4 = inlined_call_operand.hbm [shape: bf16[3,32,32], index: 4, kind: input, shape index: {}]   ;;  %s3021_s5 = inlined_call_operand.hbm [shape: bf16[3,32,32], index: 5, kind: input, shape index: {}]   ;;  %s3022_s6 = inlined_call_operand.hbm [shape: bf16[4,32,32], index: 6, kind: input, shape index: {}]   ;;  %s3023_s7 = inlined_call_operand.vmem [shape: f32[32,1], index: 7, kind: input, shape index: {}]   ;;  %s3024_s8 = inlined_call_operand.vmem [shape: f32[2,32,16], index: 8, kind: output, shape index: {}]  }
   0x1   :  { %15 = vsyncpa [#allocation3 + $0x1], 0 }
   0x2   :  { %16 = vsyncpa [#allocation5], 0 }
   0x3   :  { %17 = vsyncpa [#allocation8], 0  ;;  %s2647_s27 = smov 0   ;;  %s2649_s28 = smov 0  }
   0x4   :  { %s2651_s29 = smov 0   ;;  %s2653_s30 = smov 0  }
   0x5 LB: > { %s2666_s9 = sadd.s32 4294967295, %s2588_s30   ;;  %p69_p0 = scmp.ne.s32.totalorder %s2580_s28, %s2576_s27  ;;  %s2588_s30 = sphi %s2653_s30, %s3042_s30   ;;  %s2584_s29 = sphi %s2651_s29, %s3041_s29   ;;  %s2580_s28 = sphi %s2649_s28, %s3040_s28   ;;  %s2576_s27 = sphi %s2647_s27, %s3039_s27  }
   0x6   : > { %p3025_p1 = scmp.eq.s32.totalorder %s2666_s9, 0  ;;  %p1989_p2 = scmp.ge.s32.totalorder %s2588_s30, 1 }
   0x7   : > { %p237_p3 = scmp.lt.s32.totalorder %s2588_s30, 3  ;;  %s2590_s12 = smov [#allocation4]  }
   0x8   : > { %p2674_p4 = por %p3025_p1, %p69_p0  ;;  %s249_s13 = sshll.u32 %s2590_s12, 4  ;;  %s2682_s13 = int_to_ptr.vmem [resolvable:$true] %s249_s13 }
   0x9   : > { %p2678_p5 = pnand %p1989_p2, %p237_p3  ;;  %s2591_s15 = smov [#allocation7]  }
   0xa   : > { %s3028_s10 = scalar_select %p2674_p4, 1, 0 }
   0xb   : > { %s3029_s11 = scalar_select %p2678_p5, 1, 0 }
   0xc   : > { %p2279_p6 = pneg %p2678_p5  ;;  %s275_s16 = sshll.u32 %s2591_s15, 4  ;;  %s2692_s16 = int_to_ptr.vmem [resolvable:$true] %s275_s16 }
   0xd   : > { %s2592_s17 = smov [#allocation6]   ;;  %s2404_s21 = scalar_lea.hbm %s3019_s3, 768 }
   0xe   : > { %p2688_p7 = pnand %p2279_p6, %p3025_p1  ;;  %s2694_s18 = sshll.u32 %s2592_s17, 4  ;;  %s263_s18 = int_to_ptr.vmem [resolvable:$true] %s2694_s18 }
   0xf   : > { %p2405_p8 = scmp.ne.s32.totalorder %s3019_s3, %s2404_s21  ;;  %p2411_p12 = scmp.lt.u32.totalorder %s2404_s21, %s3019_s3 }
  0x10   : > { %p2704_p9 = pneg %p2688_p7 }
  0x12   : > { %p2407_p10 = pnand %p2704_p9, %p2405_p8 }
  0x14   : > { %p2408_p11 = pneg %p2407_p10 }
  0x16   : > { %p2413_p13 = pnand %p2411_p12, %p2408_p11 }
  0x18   : > { %2416 = shalt.err (!%p2413_p13)
}
  0x19   : > { %s2417_s27 = scalar_lea.vmem %s2682_s13, 768  ;;  %p2425_p6 = scmp.lt.s32.totalorder %s2682_s13, %s2682_s13 }
  0x1a   : > { %p2418_p0 = scmp.ne.s32.totalorder %s2682_s13, %s2417_s27  ;;  %p2426_p1 = scmp.lt.s32.totalorder %s2417_s27, %s2417_s27 }
  0x1c   : > { %p2420_p2 = pnand %p2418_p0, %p2704_p9  ;;  %p2427_p8 = por %p2426_p1, %p2425_p6 }
  0x1e   : > { %p2421_p3 = pneg %p2420_p2 }
  0x20   : > { %p2428_p10 = pnand %p2427_p8, %p2421_p3 }
  0x22   : > { %2431 = shalt.err (!%p2428_p10)
}
  0x23   : > { %s2593_s12 = smov 64   ;;  %s2594_s15 = smov 4  }
  0x24   : > { %2282 = dma.hbm_to_vmem [thread:$0]  (!%p2688_p7), %s3019_s3, 768, %s2682_s13, [#allocation5], %s2593_s12, %s2593_s12, %s2594_s15  }
  0x25   : > { %s2432_s22 = scalar_lea.hbm %s3021_s5, 768 }
  0x26   : > { %p2433_p1 = scmp.ne.s32.totalorder %s3021_s5, %s2432_s22  ;;  %p2439_p13 = scmp.lt.u32.totalorder %s2432_s22, %s3021_s5 }
  0x28   : > { %p2435_p11 = pnand %p2433_p1, %p2704_p9 }
  0x2a   : > { %p2436_p12 = pneg %p2435_p11 }
  0x2c   : > { %p2441_p0 = pnand %p2439_p13, %p2436_p12 }
  0x2e   : > { %2444 = shalt.err (!%p2441_p0)
}
  0x2f   : > { %s2445_s13 = scalar_lea.vmem %s2692_s16, 768  ;;  %p2453_p8 = scmp.lt.s32.totalorder %s2692_s16, %s2692_s16 }
  0x30   : > { %p2446_p2 = scmp.ne.s32.totalorder %s2692_s16, %s2445_s13  ;;  %p2454_p10 = scmp.lt.s32.totalorder %s2445_s13, %s2445_s13 }
  0x32   : > { %p2448_p3 = pnand %p2446_p2, %p2704_p9  ;;  %p2455_p1 = por %p2454_p10, %p2453_p8 }
  0x34   : > { %p2449_p6 = pneg %p2448_p3 }
  0x36   : > { %p2456_p11 = pnand %p2455_p1, %p2449_p6 }
  0x38   : > { %2459 = shalt.err (!%p2456_p11)
}
  0x39   : > { %2288 = dma.hbm_to_vmem [thread:$0]  (!%p2688_p7), %s3021_s5, 768, %s2692_s16, [#allocation8], %s2593_s12, %s2593_s12, %s2594_s15  }
  0x3a   : > { %s2460_s22 = scalar_lea.hbm %s3020_s4, 768 }
  0x3b   : > { %p2461_p12 = scmp.ne.s32.totalorder %s3020_s4, %s2460_s22  ;;  %p2467_p2 = scmp.lt.u32.totalorder %s2460_s22, %s3020_s4 }
  0x3d   : > { %p2463_p13 = pnand %p2461_p12, %p2704_p9 }
  0x3f   : > { %p2464_p0 = pneg %p2463_p13 }
  0x41   : > { %p2469_p3 = pnand %p2467_p2, %p2464_p0 }
  0x43   : > { %2472 = shalt.err (!%p2469_p3)
}
  0x44   : > { %s2473_s13 = scalar_lea.vmem %s263_s18, 768  ;;  %p2481_p1 = scmp.lt.s32.totalorder %s263_s18, %s263_s18 }
  0x45   : > { %p2474_p6 = scmp.ne.s32.totalorder %s263_s18, %s2473_s13  ;;  %p2482_p11 = scmp.lt.s32.totalorder %s2473_s13, %s2473_s13 }
  0x47   : > { %p2476_p8 = pnand %p2474_p6, %p2704_p9  ;;  %p2483_p4 = por %p2482_p11, %p2481_p1 }
  0x49   : > { %p2477_p10 = pneg %p2476_p8 }
  0x4b   : > { %p2484_p5 = pnand %p2483_p4, %p2477_p10 }
  0x4d   : > { %2487 = shalt.err (!%p2484_p5)
}
  0x4e   : > { %2285 = dma.hbm_to_vmem [thread:$0]  (!%p2688_p7), %s3020_s4, 768, %s263_s18, [#allocation5], %s2593_s12, %s2593_s12, %s2594_s15  }
  0x4f   : > { %s2595_s19 = smov [#allocation9]   ;;  %s2488_s23 = scalar_lea.hbm %s3022_s6, 1024 }
  0x50   : > { %s288_s20 = sshll.u32 %s2595_s19, 4  ;;  %p2489_p4 = scmp.ne.s32.totalorder %s3022_s6, %s2488_s23  ;;  %s289_s20 = int_to_ptr.vmem [resolvable:$true] %s288_s20 }
  0x51   : > { %p2495_p13 = scmp.lt.u32.totalorder %s2488_s23, %s3022_s6 }
  0x52   : > { %p2491_p5 = pnand %p2489_p4, %p2704_p9 }
  0x54   : > { %p2492_p12 = pneg %p2491_p5 }
  0x56   : > { %p2497_p0 = pnand %p2495_p13, %p2492_p12 }
  0x58   : > { %2500 = shalt.err (!%p2497_p0)
}
  0x59   : > { %s2501_s18 = scalar_lea.vmem %s289_s20, 1024  ;;  %p2509_p8 = scmp.lt.s32.totalorder %s289_s20, %s289_s20 }
  0x5a   : > { %p2502_p2 = scmp.ne.s32.totalorder %s289_s20, %s2501_s18  ;;  %p2510_p10 = scmp.lt.s32.totalorder %s2501_s18, %s2501_s18 }
  0x5c   : > { %p2504_p3 = pnand %p2502_p2, %p2704_p9  ;;  %p2511_p1 = por %p2510_p10, %p2509_p8 }
  0x5e   : > { %p2505_p6 = pneg %p2504_p3 }
  0x60   : > { %p2512_p11 = pnand %p2511_p1, %p2505_p6 }
  0x62   : > { %2515 = shalt.err (!%p2512_p11)
}
  0x63   : > { %2291 = dma.hbm_to_vmem [thread:$0]  (!%p2688_p7), %s3022_s6, 1024, %s289_s20, [#allocation8], %s2593_s12, %s2593_s12, %s2594_s15  }
  0x64   : > { %s2798_s24 = sadd.s32 1, %s2588_s30   ;;  %s56_s14 = sadd.s32 1, %s2584_s29 }
  0x65   : > { %s53_s19 = ssub.s32 %s2588_s30, %s2798_s24  ;;  %p63_p9 = scmp.ne.s32.totalorder %s2584_s29, %s2580_s28 }
  0x66   : > { %p54_p4 = scmp.eq.s32.totalorder %s53_s19, 0  ;;  %p64_p5 = scmp.eq.s32.totalorder %s2588_s30, 0 }
  0x67   : > { %p2300_p12 = scmp.lt.s32.totalorder %s2588_s30, 2  ;;  %s313_s21 = sand.u32 1, %s2584_s29  }
  0x68   : > { %s2809_s22 = scalar_select %p54_p4, %s2584_s29, %s56_s14  }
  0x69   : > { %p65_p13 = por %p64_p5, %p63_p9  ;;  %s1995_s23 = sshll.u32 %s313_s21, 5 }
  0x6a   : > { %s2071_s25 = sshll.u32 %s2588_s30, 9  ;;  %s317_s12 = scalar_lea.vmem [#allocation2], %s1995_s23 }
  0x6b   : > { %s2815_s13 = scalar_lea.hbm %s3017_s1, %s2071_s25  ;;  %s324_s15 = sshll.u32 %s317_s12, 4  ;;  %s2821_s15 = int_to_ptr.vmem [resolvable:$true] %s324_s15 }
  0x6c   : > { %p2817_p7 = pnand %p2300_p12, %p65_p13  ;;  %s2823_s30 = scalar_lea.sflag [#allocation3], %s313_s21 }
  0x6d   : > { %s2516_s18 = scalar_lea.hbm %s2815_s13, 512  ;;  %s2521_s14 = scalar_lea.hbm %s3017_s1, 1024 }
  0x6e   : > { %p2517_p0 = scmp.ne.s32.totalorder %s2815_s13, %s2516_s18  ;;  %p2518_p2 = pneg %p2817_p7 }
  0x6f   : > { %p2522_p8 = scmp.lt.u32.totalorder %s2815_s13, %s3017_s1  ;;  %p2523_p10 = scmp.lt.u32.totalorder %s2521_s14, %s2516_s18 }
  0x70   : > { %p2519_p3 = pnand %p2518_p2, %p2517_p0  ;;  %p2525_p11 = scmp.lt.u32.totalorder %s2516_s18, %s2815_s13 }
  0x71   : > { %p2524_p1 = por %p2523_p10, %p2522_p8 }
  0x72   : > { %p2520_p6 = pneg %p2519_p3 }
  0x73   : > { %p2526_p9 = por %p2525_p11, %p2524_p1 }
  0x75   : > { %p2527_p4 = pnand %p2526_p9, %p2520_p6 }
  0x77   : > { %2530 = shalt.err (!%p2527_p4)
}
  0x78   : > { %s2531_s21 = scalar_lea.vmem %s2821_s15, 512  ;;  %s2596_s25 = smov [#allocation2]  }
  0x79   : > { %p2532_p5 = scmp.ne.s32.totalorder %s2821_s15, %s2531_s21  ;;  %s2536_s26 = sshll.u32 %s2596_s25, 4  ;;  %s2537_s26 = int_to_ptr.vmem [resolvable:$false] %s2536_s26 }
  0x7a   : > { %s2538_s27 = scalar_lea.vmem %s2537_s26, 1024  ;;  %p2539_p0 = scmp.lt.s32.totalorder %s2821_s15, %s2537_s26 }
  0x7b   : > { %p2534_p12 = pnand %p2532_p5, %p2518_p2  ;;  %p2540_p3 = scmp.lt.s32.totalorder %s2538_s27, %s2531_s21 }
  0x7d   : > { %p2535_p13 = pneg %p2534_p12  ;;  %p2541_p8 = por %p2540_p3, %p2539_p0 }
  0x7f   : > { %p2542_p10 = pnand %p2541_p8, %p2535_p13 }
  0x81   : > { %2545 = shalt.err (!%p2542_p10)
}
  0x82   : > { %s2597_s12 = smov 128   ;;  %s2598_s18 = smov 8  }
  0x83   : > { %2295 = dma.hbm_to_vmem [thread:$0]  (!%p2817_p7), %s2815_s13, 512, %s2821_s15, %s2823_s30, %s2597_s12, %s2597_s12, %s2598_s18  }
  0x84   : > { %p3033_p2 = scmp.ne.s32.totalorder %s3029_s11, 0 }
  0x85   : > { %s346_s16 = sand.u32 (!%p3033_p2), 1, %s2580_s28   ;;  %p3034_p6 = scmp.ne.s32.totalorder (!%p3033_p2), %s3028_s10, 0 }
  0x86   : > { %344 = sbr.rel (%p3033_p2) target bundleno = 3023 (0xbcf), region = 52  ;;  %s1999_s17 = sshll.u32 (!%p3033_p2), %s346_s16, 5 }
  0x87   : > { %s347_s14 = scalar_lea.sflag (!%p3033_p2), [#allocation3], %s346_s16  ;;  %s2854_s19 = scalar_lea.vmem (!%p3033_p2), [#allocation2], %s1999_s17 }
  0x8d   : > { %2563 = dma.done.wait (%p3034_p6), %s347_s14, 512  }
  0x8e   : > { %2565 = vsyncadd (%p3034_p6), %s347_s14, 4294966784  ;;  %p3035_p1 = scmp.eq.s32.totalorder %s2666_s9, 0 }
  0x90   : > { %2567 = dma.done.wait (%p3035_p1), [#allocation5], 1536   ;;  %p3036_p7 = pmov %p3035_p1 }
  0x91   : > { %p3037_p11 = pmov %p3035_p1 }
  0x92   : > { %2569 = vsyncadd (%p3036_p7), [#allocation5], 4294965760 }
  0x93   : > { %2571 = dma.done.wait (%p3037_p11), [#allocation8], 1792   ;;  %p3038_p9 = pmov %p3035_p1 }
  0x94   : > { %p409_p4 = scmp.lt.s32.totalorder %s2666_s9, 1  ;;  %vm473_vm0 = vcmask 261120   ;;  %v2350_v6 = vld [vmem:[#allocation4] sm:$0xff]   ;;  %v2352_v7 = vld [vmem:[#allocation4 + $0x10] sm:$0xff]   ;;  %v2351_v8 = vld [vmem:[#allocation4 + $0x8] sm:$0xff]   ;;  %v2599_v10 = vmov 0.0  }
  0x95   : > { %2573 = vsyncadd (%p3038_p9), [#allocation8], 4294965504  ;;  %2135 = vmatprep.mubr.msk.bf16.mxu0 %vm473_vm0, %v2350_v6  ;;  %2143 = vmatprep.mubr.msk.bf16.mxu1 %vm473_vm0, %v2352_v7  ;;  %v2353_v9 = vld [vmem:[#allocation4 + $0x18] sm:$0xff]   ;;  %vm2600_vm1 = vmmov 0   ;;  %v2354_v24 = vld [vmem:[#allocation4 + $0x20] sm:$0xff]   ;;  %vm658_vm2 = vcmask 130048  }
  0x96   : > { %s3044_s9 = smov (!%p409_p4, %s2666_s9), 1  ;;  %v2355_v25 = vld [vmem:[#allocation4 + $0x28] sm:$0xff]   ;;  %v2356_v32 = vld [vmem:[#allocation6] sm:$0xff]   ;;  %v2357_v33 = vld [vmem:[#allocation6 + $0x8] sm:$0xff]   ;;  %vm1017_vm3 = vcmask 523264  }
  0x97   : > { %s2072_s10 = sshll.u32 %s3044_s9, 5  ;;  %v431_v60 = vld [vmem:[%s2854_s19] sm:$0xff]  ;;  %v432_v61 = vld [vmem:[%s2854_s19 + $0x8] sm:$0xff]  ;;  %v434_v6 = vld [vmem:[%s2854_s19 + $0x18] sm:$0xff]  ;;  %s2073_s20 = sshll.u32 %s3044_s9, 6 }
  0x98   : > { %s413_s15 = scalar_lea.vmem %s3016_s0, %s2072_s10  ;;  %v2358_v7 = vld [vmem:[#allocation6 + $0x10] sm:$0xff]   ;;  %s418_s21 = scalar_lea.vmem %s3018_s2, %s2073_s20 }
  0x99   : > { %v425_v0 = vld [vmem:[%s413_s15] sm:$0xff]  ;;  %v426_v1 = vld [vmem:[%s413_s15 + $0x8] sm:$0xff]  ;;  %v427_v2 = vld [vmem:[%s413_s15 + $0x10] sm:$0xff]  ;;  %s423_s13 = scalar_lea.vmem %s3024_s8, %s2072_s10 }
  0x9a   : > { %v2878_v3 = vpack.c.bf16 %v426_v1, %v425_v0  ;;  %v428_v4 = vld [vmem:[%s413_s15 + $0x18] sm:$0xff]  ;;  %v435_v1 = vpack.c.bf16 %v432_v61, %v431_v60  ;;  %v438_v60 = vld [vmem:[%s418_s21 + $0x8] sm:$0xff] }
  0x9b   : > { %v2880_v5 = vpack.c.bf16 %v428_v4, %v427_v2  ;;  %v433_v4 = vld [vmem:[%s2854_s19 + $0x10] sm:$0xff]  ;;  %v440_v61 = vld [vmem:[%s418_s21 + $0x18] sm:$0xff] }
  0x9c   : > { %2131 = vmatprep.subr.bf16.mxu0 %v2878_v3  ;;  %2139 = vmatprep.subr.bf16.mxu1 %v2878_v3 }
  0x9d   : > { %2132 = vmatpush3.bf16.msra.mxu0 %v2878_v3  ;;  %2140 = vmatpush3.bf16.msra.mxu1 %v2878_v3 }
  0x9e   : > { %2133 = vmatprep.subr.bf16.mxu0 %v2880_v5  ;;  %2141 = vmatprep.subr.bf16.mxu1 %v2880_v5 }
  0xa1   : > { %2134 = vmatpush3.bf16.msra.mxu0 %v2880_v5  ;;  %2142 = vmatpush3.bf16.msra.mxu1 %v2880_v5 }
  0xa2   : > { %2155 = vmatprep.subr.bf16.mxu1 %v2878_v3  ;;  %2147 = vmatprep.subr.bf16.mxu0 %v2599_v10 }
  0xa4   : > { %2136 = vmatmul.mubr.msk.bf16.vlgmr.msra.gmra.mrb[0].mxu0 %vm473_vm0, %v2351_v8  ;;  %2144 = vmatmul.mubr.msk.bf16.vlgmr.msra.gmra.mrb[0].mxu1 %vm473_vm0, %v2353_v9  ;;  %v436_v8 = vpack.c.bf16 %v434_v6, %v433_v4  ;;  %v2359_v9 = vld [vmem:[#allocation6 + $0x18] sm:$0xff]   ;;  %v437_v4 = vld [vmem:[%s418_s21] sm:$0xff]  ;;  %v439_v6 = vld [vmem:[%s418_s21 + $0x10] sm:$0xff] }
  0xa5   : > { %2156 = vmatpush3.bf16.msra.mxu1 %v2878_v3  ;;  %2151 = vmatprep.mubr.msk.bf16.mxu0 %vm2600_vm1, %v2599_v10 }
  0xa6   : > { %2157 = vmatprep.subr.bf16.mxu1 %v2880_v5  ;;  %2159 = vmatprep.mubr.msk.bf16.mxu1 %vm473_vm0, %v2354_v24  ;;  %v2360_v24 = vld [vmem:[#allocation6 + $0x20] sm:$0xff]  }
  0xa9   : > { %2158 = vmatpush3.bf16.msra.mxu1 %v2880_v5 }
  0xaa   : > { %2169 = vmatprep.subr.bf16.mxu1 %v2878_v3 }
  0xac   : > { %2160 = vmatmul.mubr.msk.bf16.vlgmr.msra.gmra.mrb[4].mxu1 %vm473_vm0, %v2355_v25  ;;  %v2361_v25 = vld [vmem:[#allocation6 + $0x28] sm:$0xff]  }
  0xad   : > { %2170 = vmatpush3.bf16.msra.mxu1 %v2878_v3  ;;  %2173 = vmatprep.mubr.msk.bf16.mxu1 %vm473_vm0, %v2356_v32  ;;  %v2363_v32 = vld [vmem:[#allocation7 + $0x8] sm:$0xff]  }
  0xae   : > { %2171 = vmatprep.subr.bf16.mxu1 %v2880_v5 }
  0xb1   : > { %2172 = vmatpush3.bf16.msra.mxu1 %v2880_v5 }
  0xb2   : > { %2185 = vmatprep.subr.bf16.mxu1 %v2599_v10 }
  0xb4   : > { %2174 = vmatmul.mubr.msk.bf16.vlgmr.msra.gmra.mrb[8].mxu1 %vm473_vm0, %v2357_v33 }
  0xb5   : > { %2189 = vmatprep.mubr.msk.bf16.mxu1 %vm2600_vm1, %v2599_v10 }
 0x177   : > { %v2137_v11 = vpop.f32.mrb[0].mxu0  ;;  %v2145_v13 = vpop.f32.mrb[0].mxu1 }
 0x178   : > { %v514_v12 = vpop.f32.mrb[1].mxu0  ;;  %v579_v15 = vpop.f32.mrb[1].mxu1 }
 0x179   : > { %v2138_v14 = vpop.f32.mrb[2].mxu0  ;;  %v2146_v18 = vpop.f32.mrb[2].mxu1 }
 0x17a   : > { %v595_v16 = vpack.c.bf16 %v2138_v14, %v2137_v11  ;;  %v517_v17 = vpop.f32.mrb[3].mxu0  ;;  %v597_v20 = vpack.c.bf16 %v2146_v18, %v2145_v13  ;;  %v582_v21 = vpop.f32.mrb[3].mxu1 }
 0x17b   : > { %v594_v19 = vpack.c.bf16 %v517_v17, %v514_v12  ;;  %v596_v22 = vpack.c.bf16 %v582_v21, %v579_v15 }
 0x17d   : > { %598 = vxpose.xlu0.c.b16.start [1/2] (short) (narrow) %v594_v19, 16  ;;  %2148 = vmatpush3.bf16.msra.mxu0 %v596_v22 }
 0x17e   : > { %2149 = vmatprep.subr.bf16.mxu0 %v2599_v10 }
 0x17f   : > { %v2161_v44 = vpop.f32.mrb[4].mxu1 }
 0x180   : > { %v731_v45 = vpop.f32.mrb[5].mxu1 }
 0x181   : > { %599 = vxpose.xlu0.c.b16.end [2/2] (short) (narrow) %v595_v16, 16  ;;  %2150 = vmatpush3.bf16.msra.mxu0 %v597_v20  ;;  %v2162_v46 = vpop.f32.mrb[6].mxu1 }
 0x182   : > { %v747_v47 = vpack.c.bf16 %v2162_v46, %v2161_v44  ;;  %v734_v48 = vpop.f32.mrb[7].mxu1 }
 0x183   : > { %v746_v49 = vpack.c.bf16 %v734_v48, %v731_v45 }
 0x187   : > { %v2175_v50 = vpop.f32.mrb[8].mxu1 }
 0x188   : > { %v873_v51 = vpop.f32.mrb[9].mxu1 }
 0x189   : > { %v2176_v52 = vpop.f32.mrb[10].mxu1 }
 0x18a   : > { %v954_v53 = vpack.c.bf16 %v2176_v52, %v2175_v50  ;;  %v876_v54 = vpop.f32.mrb[11].mxu1 }
 0x18b   : > { %v953_v55 = vpack.c.bf16 %v876_v54, %v873_v51 }
 0x1e3   : > { %v606_v23 = vpop.trf.xlu0 }
 0x1e4   : > { %2152 = vmatmul.mubr.msk.bf16.vlgmr.msra.gmra.mrb[4].mxu0 %vm473_vm0, %v606_v23 }
 0x1e5   : > { %2165 = vmatprep.mubr.msk.bf16.mxu0 %vm658_vm2, %v746_v49  ;;  %v2601_v49 = vmov 0  }
 0x2b7   : > { %v651_v26 = vpop.f32.mrb[4].mxu0 }
 0x2b8   : > { %v2153_v27 = vpop.f32.mrb[5].mxu0  ;;  %v659_v28 = vsel %vm658_vm2, %v651_v26, -inf }
 0x2b9   : > { %660 = vmax.xlane.f32.xlu1 %v659_v28  ;;  %v654_v29 = vpop.f32.mrb[6].mxu0 }
 0x2ba   : > { %v2154_v30 = vpop.f32.mrb[7].mxu0  ;;  %v662_v31 = vsel %vm658_vm2, %v654_v29, -inf }
 0x2bd   : > { %663 = vmax.xlane.f32.xlu1 %v662_v31  ;;  %v2362_v31 = vld [vmem:[#allocation7] sm:$0xff]  }
 0x346   : > { %v661_v34 = vpop.xlane.xlu1 %660 }
 0x347   : > { %v665_v35 = vsub.f32 %v651_v26, %v661_v34 }
 0x349   : > { %v667_v36 = vmul.f32 1.442695, %v665_v35 }
 0x34a   : > { %v664_v37 = vpop.xlane.xlu1 %663 }
 0x34b   : > { %2376 = vpow2.f32 %v667_v36  ;;  %v666_v38 = vsub.f32 %v654_v29, %v664_v37 }
 0x34d   : > { %v669_v39 = vmul.f32 1.442695, %v666_v38 }
 0x34f   : > { %2378 = vpow2.f32 %v669_v39 }
 0x355   : > { %v2377_v40 = vpop.eup %2376 }
 0x356   : > { %v671_v41 = vsel %vm658_vm2, %v2377_v40, 0.0 }
 0x357   : > { %672 = vadd.xlane.f32.xlu0 %v671_v41 }
 0x359   : > { %v2379_v42 = vpop.eup %2378 }
 0x35a   : > { %v674_v43 = vsel %vm658_vm2, %v2379_v42, 0.0 }
 0x35b   : > { %675 = vadd.xlane.f32.xlu1 %v674_v43 }
 0x388   : > { %957 = vxpose.xlu1.c.b16.start [1/2] (short) (narrow) %v953_v55, 16 }
 0x38c   : > { %958 = vxpose.xlu1.c.b16.end [2/2] (short) (narrow) %v954_v53, 16 }
 0x390   : > { %2349 = vset.pattern.permute.xlu1 %v2601_v49 }
 0x3e4   : > { %v673_v56 = vpop.xlane.xlu0 %672 }
 0x3e5   : > { %2380 = vrcp.f32 %v673_v56 }
 0x3e8   : > { %v676_v57 = vpop.xlane.xlu1 %675 }
 0x3e9   : > { %2382 = vrcp.f32 %v676_v57 }
 0x3ee   : > { %v965_v23 = vpop.trf.xlu1 }
 0x3ef   : > { %v2381_v58 = vpop.eup %2380 }
 0x3f0   : > { %v679_v62 = vmul.f32 %v2381_v58, %v2377_v40 }
 0x3f3   : > { %v2383_v59 = vpop.eup %2382 }
 0x3f4   : > { %v680_v63 = vmul.f32 %v2383_v59, %v2379_v42 }
 0x3f6   : > { %v748_v0 = vpack.c.bf16 %v680_v63, %v679_v62 }
 0x3f8   : > { %2259 = vmatprep.subr.msk.bf16.mxu0 %vm658_vm2, %v748_v0  ;;  %v756_v2 = vsel %vm658_vm2, %v748_v0, 0 }
 0x3f9   : > { %2164 = vmatpush3.bf16.xpose.msra.mxu0 %v756_v2 }
 0x3fa   : > { %2177 = vmatprep.subr.bf16.mxu0 %v435_v1 }
 0x400   : > { %2166 = vmatmul.mubr.msk.bf16.vlgmr.msra.gmra.mrb[8].mxu0 %vm658_vm2, %v747_v47 }
 0x401   : > { %2178 = vmatpush3.bf16.msra.mxu0 %v435_v1  ;;  %2181 = vmatprep.mubr.msk.bf16.mxu0 %vm473_vm0, %v2358_v7  ;;  %v442_v7 = vld [vmem:[%s418_s21 + $0x28] sm:$0xff] }
 0x402   : > { %2179 = vmatprep.subr.bf16.mxu0 %v436_v8 }
 0x405   : > { %2180 = vmatpush3.bf16.msra.mxu0 %v436_v8 }
 0x406   : > { %2193 = vmatprep.subr.bf16.mxu0 %v435_v1 }
 0x408   : > { %2182 = vmatmul.mubr.msk.bf16.vlgmr.msra.gmra.mrb[12].mxu0 %vm473_vm0, %v2359_v9  ;;  %v445_v9 = vpack.c.bf16 %v439_v6, %v437_v4 }
 0x409   : > { %2194 = vmatpush3.bf16.msra.mxu0 %v435_v1  ;;  %2197 = vmatprep.mubr.msk.bf16.mxu0 %vm473_vm0, %v2360_v24  ;;  %v446_v1 = vpack.c.bf16 %v440_v61, %v438_v60 }
 0x40a   : > { %2195 = vmatprep.subr.bf16.mxu0 %v436_v8 }
 0x40d   : > { %2196 = vmatpush3.bf16.msra.mxu0 %v436_v8  ;;  %v444_v8 = vld [vmem:[%s418_s21 + $0x38] sm:$0xff] }
 0x40e   : > { %2207 = vmatprep.subr.bf16.mxu0 %v2878_v3 }
 0x410   : > { %2198 = vmatmul.mubr.msk.bf16.vlgmr.msra.gmra.mrb[16].mxu0 %vm473_vm0, %v2361_v25 }
 0x411   : > { %2208 = vmatpush3.bf16.msra.mxu0 %v2878_v3  ;;  %2211 = vmatprep.mubr.msk.bf16.mxu0 %vm473_vm0, %v2362_v31 }
 0x412   : > { %2209 = vmatprep.subr.bf16.mxu0 %v2880_v5 }
 0x415   : > { %2210 = vmatpush3.bf16.msra.mxu0 %v2880_v5 }
 0x418   : > { %2212 = vmatmul.mubr.msk.bf16.vlgmr.msra.gmra.mrb[20].mxu0 %vm473_vm0, %v2363_v32 }
 0x419   : > { %1373 = vmatprep.mubr.bf16.mxu0 %v2601_v49 }
 0x4d3   : > { %v2167_v11 = vpop.f32.mrb[8].mxu0 }
 0x4d4   : > { %v792_v12 = vpop.f32.mrb[9].mxu0 }
 0x4d5   : > { %v2168_v13 = vpop.f32.mrb[10].mxu0 }
 0x4d6   : > { %v2929_v14 = vpack.c.bf16 %v2168_v13, %v2167_v11  ;;  %v795_v15 = vpop.f32.mrb[11].mxu0  ;;  %v448_v11 = vpack.c.bf16 %v444_v8, %v442_v7  ;;  %v443_v13 = vld [vmem:[%s418_s21 + $0x30] sm:$0xff] }
 0x4d7   : > { %v2931_v16 = vpack.c.bf16 %v795_v15, %v792_v12  ;;  %v441_v12 = vld [vmem:[%s418_s21 + $0x20] sm:$0xff] }
 0x4d8   : > { %v447_v15 = vpack.c.bf16 %v443_v13, %v441_v12 }
 0x4db   : > { %v2183_v17 = vpop.f32.mrb[12].mxu0 }
 0x4dc   : > { %v938_v18 = vpop.f32.mrb[13].mxu0 }
 0x4dd   : > { %v2184_v19 = vpop.f32.mrb[14].mxu0 }
 0x4de   : > { %v956_v20 = vpack.c.bf16 %v2184_v19, %v2183_v17  ;;  %v941_v21 = vpop.f32.mrb[15].mxu0  ;;  %v2364_v17 = vld [vmem:[#allocation7 + $0x10] sm:$0xff]  }
 0x4df   : > { %v955_v22 = vpack.c.bf16 %v941_v21, %v938_v18  ;;  %v2365_v18 = vld [vmem:[#allocation7 + $0x18] sm:$0xff]  }
 0x4e1   : > { %2186 = vmatpush3.bf16.msra.mxu1 %v955_v22 }
 0x4e2   : > { %2187 = vmatprep.subr.bf16.mxu1 %v2599_v10 }
 0x4e3   : > { %v2199_v43 = vpop.f32.mrb[16].mxu0 }
 0x4e4   : > { %v1090_v44 = vpop.f32.mrb[17].mxu0 }
 0x4e5   : > { %2188 = vmatpush3.bf16.msra.mxu1 %v956_v20  ;;  %v2200_v45 = vpop.f32.mrb[18].mxu0 }
 0x4e6   : > { %v1106_v46 = vpack.c.bf16 %v2200_v45, %v2199_v43  ;;  %v1093_v47 = vpop.f32.mrb[19].mxu0 }
 0x4e7   : > { %v1105_v48 = vpack.c.bf16 %v1093_v47, %v1090_v44 }
 0x4e8   : > { %2190 = vmatmul.mubr.msk.bf16.vlgmr.msra.gmra.mrb[12].mxu1 %vm473_vm0, %v965_v23 }
 0x4e9   : > { %2203 = vmatprep.mubr.msk.bf16.mxu1 %vm1017_vm3, %v1105_v48 }
 0x4eb   : > { %v2213_v50 = vpop.f32.mrb[20].mxu0 }
 0x4ec   : > { %v1232_v51 = vpop.f32.mrb[21].mxu0 }
 0x4ed   : > { %v2214_v52 = vpop.f32.mrb[22].mxu0 }
 0x4ee   : > { %v1317_v53 = vpack.c.bf16 %v2214_v52, %v2213_v50  ;;  %v1235_v54 = vpop.f32.mrb[23].mxu0 }
 0x4ef   : > { %v1316_v55 = vpack.c.bf16 %v1235_v54, %v1232_v51 }
 0x5bb   : > { %v1010_v26 = vpop.f32.mrb[12].mxu1 }
 0x5bc   : > { %v2191_v27 = vpop.f32.mrb[13].mxu1  ;;  %v1018_v10 = vsel %vm1017_vm3, %v1010_v26, -inf }
 0x5bd   : > { %1019 = vmax.xlane.f32.xlu0 %v1018_v10  ;;  %v1013_v28 = vpop.f32.mrb[14].mxu1 }
 0x5be   : > { %v2192_v29 = vpop.f32.mrb[15].mxu1  ;;  %v1021_v30 = vsel %vm1017_vm3, %v1013_v28, -inf }
 0x5c1   : > { %1022 = vmax.xlane.f32.xlu0 %v1021_v30 }
 0x64a   : > { %v1020_v33 = vpop.xlane.xlu0 %1019 }
 0x64b   : > { %v1024_v34 = vsub.f32 %v1010_v26, %v1020_v33 }
 0x64d   : > { %v1026_v35 = vmul.f32 1.442695, %v1024_v34 }
 0x64e   : > { %v1023_v36 = vpop.xlane.xlu0 %1022 }
 0x64f   : > { %2384 = vpow2.f32 %v1026_v35  ;;  %v1025_v37 = vsub.f32 %v1013_v28, %v1023_v36 }
 0x651   : > { %v1028_v38 = vmul.f32 1.442695, %v1025_v37  ;;  %v2366_v37 = vld [vmem:[#allocation9 + $0x10] sm:$0xff]  }
 0x653   : > { %2386 = vpow2.f32 %v1028_v38  ;;  %v2367_v38 = vld [vmem:[#allocation9 + $0x18] sm:$0xff]  }
 0x659   : > { %v2385_v39 = vpop.eup %2384 }
 0x65a   : > { %v1030_v40 = vsel %vm1017_vm3, %v2385_v39, 0.0 }
 0x65b   : > { %1031 = vadd.xlane.f32.xlu0 %v1030_v40  ;;  %v2371_v40 = vld [vmem:[#allocation7 + $0x28] sm:$0xff]  }
 0x65d   : > { %v2387_v41 = vpop.eup %2386 }
 0x65e   : > { %v1033_v42 = vsel %vm1017_vm3, %v2387_v41, 0.0 }
 0x65f   : > { %1034 = vadd.xlane.f32.xlu0 %v1033_v42 }
 0x68c   : > { %1322 = vxpose.xlu0.c.b16.start [1/2] (short) (narrow) %v1316_v55, 16 }
 0x690   : > { %1323 = vxpose.xlu0.c.b16.end [2/2] (short) (narrow) %v1317_v53, 16 }
 0x699   : > { %2348 = vset.pattern.permute.xlu0 %v2601_v49 }
 0x6e8   : > { %v1032_v56 = vpop.xlane.xlu0 %1031 }
 0x6e9   : > { %2388 = vrcp.f32 %v1032_v56 }
 0x6ec   : > { %v1035_v57 = vpop.xlane.xlu0 %1034 }
 0x6ed   : > { %2390 = vrcp.f32 %v1035_v57 }
 0x6f2   : > { %v1330_v36 = vpop.trf.xlu0 }
 0x6f3   : > { %v2389_v58 = vpop.eup %2388 }
 0x6f4   : > { %v1038_v62 = vmul.f32 %v2389_v58, %v2385_v39  ;;  %v2368_v39 = vld [vmem:[#allocation9] sm:$0xff]  }
 0x6f7   : > { %v2391_v59 = vpop.eup %2390 }
 0x6f8   : > { %v1039_v63 = vmul.f32 %v2391_v59, %v2387_v41 }
 0x6fa   : > { %v1107_v0 = vpack.c.bf16 %v1039_v63, %v1038_v62 }
 0x6fc   : > { %2260 = vmatprep.subr.msk.bf16.mxu1 %vm1017_vm3, %v1107_v0  ;;  %v1115_v2 = vsel %vm1017_vm3, %v1107_v0, 0 }
 0x6fd   : > { %2202 = vmatpush3.bf16.xpose.msra.mxu1 %v1115_v2 }
 0x6fe   : > { %1263 = vmatprep.subr.bf16.mxu1 %v446_v1 }
 0x704   : > { %2204 = vmatmul.mubr.msk.bf16.vlgmr.msra.gmra.mrb[16].mxu1 %vm1017_vm3, %v1106_v46 }
 0x705   : > { %1264 = vmatpush1.bf16.msra.mxu1 %v445_v9  ;;  %1295 = vmatprep.mubr.bf16.mxu1 %v2601_v49 }
 0x706   : > { %1265 = vmatprep.subr.bf16.mxu1 %v448_v11 }
 0x709   : > { %1266 = vmatpush1.bf16.msra.mxu1 %v447_v15 }
 0x70a   : > { %1430 = vmatprep.subr.bf16.mxu1 %v446_v1 }
 0x70c   : > { %2046 = vmatmul.mubr.msk.bf16.vlgmr.msra.gmra.mrb[20].mxu1 %vm473_vm0, %v2364_v17 }
 0x70d   : > { %1305 = vmatprep.mubr.bf16.mxu1 %v2601_v49  ;;  %1431 = vmatpush1.bf16.msra.mxu1 %v445_v9 }
 0x70e   : > { %1432 = vmatprep.subr.bf16.mxu1 %v448_v11 }
 0x711   : > { %1433 = vmatpush1.bf16.msra.mxu1 %v447_v15 }
 0x714   : > { %2047 = vmatmul.mubr.msk.bf16.gmra.mrb[24].mxu1 %vm473_vm0, %v2365_v18 }
 0x715   : > { %1462 = vmatprep.mubr.bf16.mxu1 %v2601_v49 }
 0x7d7   : > { %v2205_v19 = vpop.f32.mrb[16].mxu1 }
 0x7d8   : > { %v1151_v20 = vpop.f32.mrb[17].mxu1 }
 0x7d9   : > { %v2206_v21 = vpop.f32.mrb[18].mxu1 }
 0x7da   : > { %v1167_v22 = vpack.c.bf16 %v2206_v21, %v2205_v19  ;;  %v1154_v23 = vpop.f32.mrb[19].mxu1 }
 0x7db   : > { %v1166_v24 = vpack.c.bf16 %v1154_v23, %v1151_v20 }
 0x7df   : > { %v1297_v25 = vpop.f32.mrb[20].mxu1 }
 0x7e0   : > { %v1299_v26 = vpop.f32.mrb[21].mxu1 }
 0x7e1   : > { %v1301_v27 = vpop.f32.mrb[22].mxu1 }
 0x7e2   : > { %v1318_v10 = vpack.c.bf16 %v1301_v27, %v1297_v25  ;;  %v1303_v28 = vpop.f32.mrb[23].mxu1  ;;  %v2373_v25 = vld [vmem:[#allocation9 + $0x28] sm:$0xff]   ;;  %v1827_v27 = vld [vmem:[%s3023_s7] sm:$0xff] }
 0x7e3   : > { %v1319_v29 = vpack.c.bf16 %v1303_v28, %v1299_v26  ;;  %v2374_v26 = vld [vmem:[#allocation9 + $0x30] sm:$0xff]   ;;  %1833 = vperm.xlu0 %2348, %v1827_v27   ;;  %v1829_v28 = vld [vmem:[%s3023_s7 + $0x10] sm:$0xff] }
 0x7e5   : > { %1341 = vmatprep.subr.bf16.mxu0 %v1319_v29  ;;  %v1830_v29 = vld [vmem:[%s3023_s7 + $0x18] sm:$0xff] }
 0x7e6   : > { %1342 = vmatpush1.bf16.msra.mxu0 %v1318_v10  ;;  %v1828_v10 = vld [vmem:[%s3023_s7 + $0x8] sm:$0xff] }
 0x7e7   : > { %v1307_v30 = vpop.f32.mrb[24].mxu1  ;;  %1843 = vperm.xlu0 %2348, %v1829_v28  }
 0x7e8   : > { %v1309_v31 = vpop.f32.mrb[25].mxu1 }
 0x7e9   : > { %v1311_v32 = vpop.f32.mrb[26].mxu1 }
 0x7ea   : > { %v1320_v33 = vpack.c.bf16 %v1311_v32, %v1307_v30  ;;  %v1313_v34 = vpop.f32.mrb[27].mxu1 }
 0x7eb   : > { %v1321_v35 = vpack.c.bf16 %v1313_v34, %v1309_v31  ;;  %1848 = vperm.xlu0 %2348, %v1830_v29  }
 0x7ed   : > { %1343 = vmatprep.subr.bf16.mxu0 %v1321_v35 }
 0x7ee   : > { %1344 = vmatpush1.bf16.msra.mxu0 %v1320_v33 }
 0x7ef   : > { %2215 = vmatprep.subr.bf16.mxu0 %v2931_v16 }
 0x7f1   : > { %2048 = vmatmul.mubr.msk.bf16.vlgmr.msra.gmra.mrb[24].mxu0 %vm473_vm0, %v1330_v36 }
 0x7f2   : > { %2216 = vmatpush3.bf16.msra.mxu0 %v2931_v16  ;;  %2219 = vmatprep.mubr.msk.bf16.mxu0 %vm473_vm0, %v2366_v37  ;;  %v2369_v16 = vld [vmem:[#allocation9 + $0x8] sm:$0xff]  }
 0x7f3   : > { %2217 = vmatprep.subr.bf16.mxu0 %v2929_v14 }
 0x7f6   : > { %2218 = vmatpush3.bf16.msra.mxu0 %v2929_v14  ;;  %v2370_v14 = vld [vmem:[#allocation7 + $0x20] sm:$0xff]  }
 0x7f7   : > { %2223 = vmatprep.subr.bf16.mxu0 %v2878_v3  ;;  %2051 = vmatmul.mubr.msk.bf16.vlgmr.msra.gmra.mrb[28].mxu1 %vm473_vm0, %v2370_v14 }
 0x7f8   : > { %1472 = vmatprep.mubr.bf16.mxu1 %v2601_v49 }
 0x7f9   : > { %2220 = vmatmul.mubr.msk.bf16.vlgmr.msra.gmra.mrb[28].mxu0 %vm473_vm0, %v2367_v38 }
 0x7fa   : > { %2224 = vmatpush3.bf16.msra.mxu0 %v2878_v3  ;;  %2227 = vmatprep.mubr.msk.bf16.mxu0 %vm473_vm0, %v2368_v39 }
 0x7fb   : > { %2225 = vmatprep.subr.bf16.mxu0 %v2880_v5 }
 0x7fe   : > { %2226 = vmatpush3.bf16.msra.mxu0 %v2880_v5 }
 0x7ff   : > { %2231 = vmatprep.subr.bf16.mxu0 %v1166_v24  ;;  %2052 = vmatmul.mubr.msk.bf16.gmra.mrb[32].mxu1 %vm473_vm0, %v2371_v40 }
 0x805   : > { %2228 = vmatmul.mubr.msk.bf16.vlgmr.msra.gmra.mrb[28].mxu0 %vm473_vm0, %v2369_v16  ;;  %v2375_v16 = vld [vmem:[#allocation9 + $0x38] sm:$0xff]  }
 0x806   : > { %2232 = vmatpush3.bf16.msra.mxu0 %v1166_v24  ;;  %v2372_v24 = vld [vmem:[#allocation9 + $0x20] sm:$0xff]  }
 0x807   : > { %2233 = vmatprep.subr.bf16.mxu0 %v1167_v22  ;;  %2235 = vmatprep.mubr.msk.bf16.mxu0 %vm473_vm0, %v2372_v24 }
 0x80a   : > { %2234 = vmatpush3.bf16.msra.mxu0 %v1167_v22 }
 0x811   : > { %2236 = vmatmul.mubr.msk.bf16.vlgmr.msra.gmra.mrb[28].mxu0 %vm473_vm0, %v2373_v25 }
 0x812   : > { %2243 = vmatprep.mubr.msk.bf16.mxu0 %vm473_vm0, %v2374_v26 }
 0x862   : > { %v1834_v14 = vpop.permute.xlu0 %1833 }
 0x866   : > { %v1844_v40 = vpop.permute.xlu0 %1843 }
 0x8c4   : > { %v1375_v3 = vpop.f32.mrb[24].mxu0 }
 0x8c5   : > { %v1377_v41 = vpop.f32.mrb[25].mxu0 }
 0x8c6   : > { %v1379_v42 = vpop.f32.mrb[26].mxu0  ;;  %v1384_v43 = vmax.f32 %v1375_v3, %v1377_v41 }
 0x8c7   : > { %v1381_v5 = vpop.f32.mrb[27].mxu0 }
 0x8c8   : > { %1385 = vmax.xlane.f32.xlu1 %v1384_v43  ;;  %v1387_v44 = vmax.f32 %v1379_v42, %v1381_v5 }
 0x8ca   : > { %v1464_v61 = vpop.f32.mrb[28].mxu1 }
 0x8cb   : > { %v1466_v62 = vpop.f32.mrb[29].mxu1 }
 0x8cc   : > { %1388 = vmax.xlane.f32.xlu1 %v1387_v44  ;;  %v1468_v63 = vpop.f32.mrb[30].mxu1  ;;  %v1849_v44 = vpop.permute.xlu0 %1848 }
 0x8cd   : > { %v1483_v0 = vpack.c.bf16 %v1468_v63, %v1464_v61  ;;  %v1470_v1 = vpop.f32.mrb[31].mxu1 }
 0x8ce   : > { %v1484_v2 = vpack.c.bf16 %v1470_v1, %v1466_v62 }
 0x8d0   : > { %1521 = vmatprep.mubr.bf16.mxu1 %v1484_v2 }
 0x8d2   : > { %v1474_v4 = vpop.f32.mrb[32].mxu1 }
 0x8d3   : > { %v1476_v6 = vpop.f32.mrb[33].mxu1 }
 0x8d4   : > { %v1478_v7 = vpop.f32.mrb[34].mxu1 }
 0x8d5   : > { %v1485_v8 = vpack.c.bf16 %v1478_v7, %v1474_v4  ;;  %v1480_v9 = vpop.f32.mrb[35].mxu1 }
 0x8d6   : > { %v1486_v11 = vpack.c.bf16 %v1480_v9, %v1476_v6 }
 0x955   : > { %v1386_v45 = vpop.xlane.xlu1 %1385 }
 0x956   : > { %v1390_v46 = vsub.f32 %v1375_v3, %v1386_v45  ;;  %v1391_v47 = vsub.f32 %v1377_v41, %v1386_v45 }
 0x958   : > { %v1394_v48 = vmul.f32 1.442695, %v1390_v46  ;;  %v1396_v50 = vmul.f32 1.442695, %v1391_v47 }
 0x959   : > { %v1389_v51 = vpop.xlane.xlu1 %1388 }
 0x95a   : > { %2392 = vpow2.f32 %v1394_v48  ;;  %v1392_v52 = vsub.f32 %v1379_v42, %v1389_v51  ;;  %v1393_v49 = vsub.f32 %v1381_v5, %v1389_v51 }
 0x95b   : > { %2394 = vpow2.f32 %v1396_v50 }
 0x95c   : > { %v1398_v53 = vmul.f32 1.442695, %v1392_v52  ;;  %v1400_v54 = vmul.f32 1.442695, %v1393_v49 }
 0x95e   : > { %2396 = vpow2.f32 %v1398_v53 }
 0x95f   : > { %2398 = vpow2.f32 %v1400_v54 }
 0x964   : > { %v2393_v55 = vpop.eup %2392 }
 0x965   : > { %v2395_v56 = vpop.eup %2394 }
 0x966   : > { %v1402_v57 = vadd.f32 %v2395_v56, %v2393_v55 }
 0x968   : > { %v2397_v58 = vpop.eup %2396  ;;  %1403 = vadd.xlane.f32.xlu1 %v1402_v57 }
 0x969   : > { %v2399_v59 = vpop.eup %2398 }
 0x96a   : > { %v1405_v60 = vadd.f32 %v2399_v59, %v2397_v58 }
 0x96c   : > { %1406 = vadd.xlane.f32.xlu1 %v1405_v60 }
 0x97d   : > { %1838 = vperm.xlu1 %2349, %v1828_v10  }
 0x9f5   : > { %v1404_v12 = vpop.xlane.xlu1 %1403 }
 0x9f6   : > { %2400 = vrcp.f32 %v1404_v12 }
 0x9f9   : > { %v1407_v13 = vpop.xlane.xlu1 %1406 }
 0x9fa   : > { %2402 = vrcp.f32 %v1407_v13 }
 0x9fd   : > { %v1839_v43 = vpop.permute.xlu1 %1838 }
 0xa00   : > { %v2401_v15 = vpop.eup %2400 }
 0xa01   : > { %v1411_v18 = vmul.f32 %v2401_v15, %v2395_v56  ;;  %v1410_v20 = vmul.f32 %v2401_v15, %v2393_v55 }
 0xa04   : > { %v2403_v17 = vpop.eup %2402 }
 0xa05   : > { %v1413_v19 = vmul.f32 %v2403_v17, %v2399_v59  ;;  %v1412_v21 = vmul.f32 %v2403_v17, %v2397_v58 }
 0xa07   : > { %v1488_v22 = vpack.c.bf16 %v1413_v19, %v1411_v18  ;;  %v1487_v23 = vpack.c.bf16 %v1412_v21, %v1410_v20 }
 0xa09   : > { %1489 = vmatprep.subr.bf16.mxu1 %v1488_v22 }
 0xa0a   : > { %1490 = vmatpush1.bf16.xpose.msra.mxu1 %v1487_v23 }
 0xa11   : > { %1522 = vmatmul.mubr.bf16.vlgmr.msra.gmra.mrb[36].mxu1 %v1483_v0 }
 0xa12   : > { %1529 = vmatprep.mubr.bf16.mxu1 %v1486_v11 }
 0xa19   : > { %1530 = vmatmul.mubr.bf16.gmra.mrb[40].mxu1 %v1485_v8 }
 0xae4   : > { %v1523_v30 = vpop.f32.mrb[36].mxu1 }
 0xae5   : > { %v1525_v31 = vpop.f32.mrb[37].mxu1 }
 0xae6   : > { %v1526_v32 = vpop.f32.mrb[38].mxu1 }
 0xae7   : > { %v1538_v33 = vpack.c.bf16 %v1526_v32, %v1523_v30  ;;  %v1528_v34 = vpop.f32.mrb[39].mxu1 }
 0xae9   : > { %2239 = vmatprep.subr.bf16.mxu0 %v1538_v33 }
 0xaea   : > { %2240 = vmatpush3.bf16.msra.mxu0 %v1538_v33 }
 0xaec   : > { %v1531_v35 = vpop.f32.mrb[40].mxu1 }
 0xaed   : > { %v1533_v36 = vpop.f32.mrb[41].mxu1 }
 0xaee   : > { %v1534_v37 = vpop.f32.mrb[42].mxu1 }
 0xaef   : > { %v1539_v38 = vpack.c.bf16 %v1534_v37, %v1531_v35  ;;  %v1536_v39 = vpop.f32.mrb[43].mxu1 }
 0xaf1   : > { %2241 = vmatprep.subr.bf16.mxu0 %v1539_v38 }
 0xaf2   : > { %2242 = vmatpush3.bf16.msra.mxu0 %v1539_v38 }
 0xaf5   : > { %2244 = vmatmul.mubr.msk.bf16.vlgmr.msra.gmra.mrb[28].mxu0 %vm473_vm0, %v2375_v16 }
 0xbc8   : > { %v2245_v3 = vpop.f32.mrb[28].mxu0 }
 0xbc9   : > { %v1853_v41 = vadd.f32 %v2245_v3, %v1844_v40  ;;  %v1808_v42 = vpop.f32.mrb[29].mxu0 }
 0xbca   : > { %v1851_v5 = vadd.f32 %v1834_v14, %v1808_v42  ;;  %v2246_v45 = vpop.f32.mrb[30].mxu0 }
 0xbcb   : > { %1857 = vst.msk [vmem:[%s423_s13 + $0x10] sm:$0xff] %vm658_vm2, %v1853_v41  ;;  %v1854_v46 = vadd.f32 %v2246_v45, %v1849_v44  ;;  %v1811_v47 = vpop.f32.mrb[31].mxu0 }
 0xbcc   : > { %1855 = vst.msk [vmem:[%s423_s13] sm:$0xff] %vm658_vm2, %v1851_v5  ;;  %v1852_v48 = vadd.f32 %v1839_v43, %v1811_v47 }
 0xbcd   : > { %1858 = vst.msk [vmem:[%s423_s13 + $0x18] sm:$0xff] %vm658_vm2, %v1854_v46 }
 0xbce   : > { %1856 = vst.msk [vmem:[%s423_s13 + $0x8] sm:$0xff] %vm658_vm2, %v1852_v48 }
 0xbcf PF: > { %p20_p5 = scmp.ge.s32.totalorder %s2798_s24, 4   ;;  %s3039_s27 = smov %s2580_s28 }
 0xbd0   : > { %s3040_s28 = smov %s2584_s29  ;;  %s3041_s29 = smov %s2809_s22 }
 0xbd1   : > { %s3042_s30 = smov %s2798_s24  ;;  %22 = sbr.rel (!%p20_p5) target bundleno = 5 (0x5), region = 123 }
 0xbd8   :  { %1880 = vsyncpa [#allocation3], 1 }
 0xbd9   :  { %1882 = vsyncpa [#allocation3 + $0x1], 1 }
 0xbda   :  { %1883 = vsyncpa [#allocation5], 1 }
 0xbdb   :  { %1884 = vsyncpa [#allocation8], 1 }

</bundles_post_ra>
